<compile_context>
chip_gen: v6e
topology: v6e:2x2x1
jax: 0.10.0
libtpu: 0.0.40
codegen_flags: <defaults>
</compile_context>

<pallas_src>
import functools
import math

import jax
import jax.numpy as jnp
from jax.experimental import pallas as pl
from jax.experimental.pallas import tpu as pltpu

_NEG_INF = -1e30   # large finite negative: avoids inf-inf NaN hazards


# ----------------- kernel 1: fused QKV projection + RoPE ---------------------

def _qkv_rope_kernel(x_ref, wqkv_ref, cos_ref, sin_ref, q_ref, k_ref, v_ref,
                     acc_ref, *, num_heads, num_kv_heads, head_dim):
    H, KV, hd = num_heads, num_kv_heads, head_dim
    half = hd // 2
    kk = pl.program_id(2)

    @pl.when(kk == 0)
    def _init():
        acc_ref[...] = jnp.zeros_like(acc_ref)

    # One fused bf16 MXU matmul per D-chunk (weight streamed, never fully
    # resident), f32 accumulation.
    acc_ref[...] += jnp.dot(x_ref[0], wqkv_ref[...],
                            preferred_element_type=jnp.float32)

    @pl.when(kk == pl.num_programs(2) - 1)
    def _finalize():
        # bf16 RoPE math (packed bf16 VALU on v6e/v7x); stores are bf16 anyway.
        y = acc_ref[...].astype(jnp.bfloat16)        # (ts, (H+2KV)*hd)
        cos = cos_ref[...]                            # (ts, hd) bf16
        sin = sin_ref[...]                            # sign-folded sin (wrapper)

        def rope(t):                                  # applied ONCE per head
            if hd % 128 == 0:
                # production path: rotation on the XLU slot, negation folded
                # into the sin table.
                rot = pltpu.roll(t, shift=half, axis=1)
            else:
                rot = jnp.concatenate([t[:, half:], t[:, :half]], axis=-1)
            return t * cos + rot * sin

        k_base = H * hd
        v_base = (H + KV) * hd
        # Per-head layout/store plumbing (lane-aligned slabs at head_dim=128).
        for h in range(H):
            q_ref[0, h] = rope(y[:, h * hd:(h + 1) * hd]).astype(q_ref.dtype)
        for g in range(KV):
            k_ref[0, g] = rope(
                y[:, k_base + g * hd:k_base + (g + 1) * hd]).astype(k_ref.dtype)
            v_ref[0, g] = y[:, v_base + g * hd:v_base + (g + 1) * hd].astype(v_ref.dtype)


# --------- kernel 2: flash GQA attention (per KV-group, heads folded) --------

def _flash_gqa_kernel(q_ref, k_ref, v_ref, ctx_ref, m_s, l_s, acc_s,
                      *, scale, n_rep, q_tile, kv_tile, head_dim):
    tq, tk, hd = q_tile, kv_tile, head_dim
    qi = pl.program_id(1)
    ki = pl.program_id(3)

    @pl.when(ki == 0)
    def _init():
        m_s[...] = jnp.full_like(m_s, _NEG_INF)
        l_s[...] = jnp.zeros_like(l_s)
        acc_s[...] = jnp.zeros_like(acc_s)

    not_above = ki * tk <= qi * tq + (tq - 1)   # tile not entirely above diagonal
    straddles = ki * tk + (tk - 1) > qi * tq    # tile has any masked entry

    def online_update(mask_fn):
        k = k_ref[0, 0]                          # (tk, hd) bf16 - shared by the group
        v = v_ref[0, 0]
        for r in range(n_rep):                   # fold n_rep query heads per step
            q = q_ref[0, r]                      # (tq, hd) bf16
            s = jax.lax.dot_general(q, k, (((1,), (1,)), ((), ())),
                                    preferred_element_type=jnp.float32) * scale
            s = mask_fn(s)
            m_prev = m_s[r]
            m_new = jnp.maximum(m_prev, jnp.max(s, axis=-1, keepdims=True))
            alpha = jnp.exp(m_prev - m_new)
            p = jnp.exp(s - m_new)               # f32 softmax statistics
            l_s[r] = alpha * l_s[r] + jnp.sum(p, axis=-1, keepdims=True)
            acc_s[r] = alpha * acc_s[r] + jnp.dot(p.astype(v.dtype), v,
                                                  preferred_element_type=jnp.float32)
            m_s[r] = m_new

    # Interior (fully at/below diagonal) tiles: no mask construction at all.
    @pl.when(not_above & jnp.logical_not(straddles))
    def _interior():
        online_update(lambda s: s)

    # Diagonal-straddling tiles: build the (tq, tk) mask once, shared across heads.
    @pl.when(not_above & straddles)
    def _diagonal():
        row = qi * tq + jax.lax.broadcasted_iota(jnp.int32, (tq, tk), 0)
        col = ki * tk + jax.lax.broadcasted_iota(jnp.int32, (tq, tk), 1)
        neg = jnp.where(col > row, _NEG_INF, 0.0).astype(jnp.float32)
        online_update(lambda s: s + neg)

    # Last KV tile: normalize and write bf16 per-group context (no Wo here).
    @pl.when(ki == pl.num_programs(3) - 1)
    def _finalize():
        for r in range(n_rep):
            ctx = acc_s[r] * pl.reciprocal(l_s[r], approx=True)
            ctx_ref[0, 0, :, r * hd:(r + 1) * hd] = ctx.astype(ctx_ref.dtype)


# ---------------- kernel 3: decoupled output projection ----------------------

def _out_proj_kernel(ctx_ref, wo_ref, o_ref):
    g = pl.program_id(2)
    # K-chunk of n_rep*hd per step (full MXU depth at production sizes).
    y = jnp.dot(ctx_ref[0, 0], wo_ref[0], preferred_element_type=jnp.float32)

    @pl.when(g == 0)
    def _first():
        o_ref[0] = y

    @pl.when(g > 0)
    def _rest():
        o_ref[0] = o_ref[0] + y


# ---------------------------------- wrapper ----------------------------------

def gqa_forward(x, wq, wk, wv, wo, cos, sin, *, num_heads, num_kv_heads, head_dim,
                seq_tile=512, q_tile=512, kv_tile=512, d_tile=512):
    """x: (B,S,D); weights pre-transposed to (in, out); cos/sin: (S, head_dim)."""
    B, S, D = x.shape
    H, KV, hd = num_heads, num_kv_heads, head_dim
    n_rep = H // KV
    C = (H + 2 * KV) * hd
    half = hd // 2

    ts = min(S, seq_tile)
    tq = min(S, q_tile)
    tk = min(S, kv_tile)
    td = min(D, d_tile)
    assert S % ts == 0 and S % tq == 0 and S % tk == 0 and D % td == 0
    n_s, n_q, n_kv, n_k = S // ts, S // tq, S // tk, D // td

    # bf16 operands for the MXU, f32 accumulation inside the kernels.
    x_bf = x.astype(jnp.bfloat16)
    wqkv = jnp.concatenate([wq, wk, wv], axis=1).astype(jnp.bfloat16)   # (D, C)
    wo_g = wo.reshape(KV, n_rep * hd, D).astype(jnp.bfloat16)           # per-group Wo
    cos_bf = cos.astype(jnp.bfloat16)
    # Sign-folded sin so rotate_half(t) == roll(t, hd//2) with no in-kernel negation.
    sin_folded = jnp.concatenate([-sin[:, :half], sin[:, half:]],
                                 axis=-1).astype(jnp.bfloat16)

    # ---- kernel 1: fused QKV projection (weight streamed in D-chunks) + RoPE
    qkv_kernel = functools.partial(
        _qkv_rope_kernel, num_heads=H, num_kv_heads=KV, head_dim=hd)

    q_hm, k_hm, v_hm = pl.pallas_call(
        qkv_kernel,
        out_shape=(jax.ShapeDtypeStruct((B, H, S, hd), jnp.bfloat16),
                   jax.ShapeDtypeStruct((B, KV, S, hd), jnp.bfloat16),
                   jax.ShapeDtypeStruct((B, KV, S, hd), jnp.bfloat16)),
        grid=(B, n_s, n_k),
        in_specs=[pl.BlockSpec((1, ts, td), lambda b, s, k: (b, s, k)),
                  pl.BlockSpec((td, C), lambda b, s, k: (k, 0)),
                  pl.BlockSpec((ts, hd), lambda b, s, k: (s, 0)),
                  pl.BlockSpec((ts, hd), lambda b, s, k: (s, 0))],
        out_specs=(pl.BlockSpec((1, H, ts, hd), lambda b, s, k: (b, 0, s, 0)),
                   pl.BlockSpec((1, KV, ts, hd), lambda b, s, k: (b, 0, s, 0)),
                   pl.BlockSpec((1, KV, ts, hd), lambda b, s, k: (b, 0, s, 0))),
        scratch_shapes=[pltpu.VMEM((ts, C), jnp.float32)],
        compiler_params=pltpu.CompilerParams(
            dimension_semantics=("parallel", "parallel", "arbitrary"),
            vmem_limit_bytes=64 * 1024 * 1024),
    )(x_bf, wqkv, cos_bf, sin_folded)

    # ---- kernel 2: flash GQA attention, one KV group (n_rep heads) per step
    attn_kernel = functools.partial(
        _flash_gqa_kernel, scale=1.0 / math.sqrt(hd),
        n_rep=n_rep, q_tile=tq, kv_tile=tk, head_dim=hd)

    def _kv_index(b, qi, g, ki):
        # Clamp above-diagonal tiles to the last causally-needed block so the
        # block index repeats and Pallas elides the K/V DMA.
        return (b, g, jnp.minimum(ki, (qi * tq + tq - 1) // tk), 0)

    ctx = pl.pallas_call(
        attn_kernel,
        out_shape=jax.ShapeDtypeStruct((B, KV, S, n_rep * hd), jnp.bfloat16),
        grid=(B, n_q, KV, n_kv),
        in_specs=[
            pl.BlockSpec((1, n_rep, tq, hd), lambda b, qi, g, ki: (b, g, qi, 0)),
            pl.BlockSpec((1, 1, tk, hd), _kv_index),
            pl.BlockSpec((1, 1, tk, hd), _kv_index),
        ],
        out_specs=pl.BlockSpec((1, 1, tq, n_rep * hd),
                               lambda b, qi, g, ki: (b, g, qi, 0)),
        scratch_shapes=[pltpu.VMEM((n_rep, tq, 1), jnp.float32),
                        pltpu.VMEM((n_rep, tq, 1), jnp.float32),
                        pltpu.VMEM((n_rep, tq, hd), jnp.float32)],
        compiler_params=pltpu.CompilerParams(
            dimension_semantics=("parallel", "parallel", "parallel", "arbitrary"),
            vmem_limit_bytes=64 * 1024 * 1024),
    )(q_hm, k_hm, v_hm)
    # TODO(synk): on v7x, ctx/K/V could be stored fp8 (per-head scale) to halve
    # HBM traffic; validate accuracy before enabling.

    # ---- kernel 3: output projection, one K=n_rep*hd matmul per group
    out = pl.pallas_call(
        _out_proj_kernel,
        out_shape=jax.ShapeDtypeStruct((B, S, D), jnp.float32),
        grid=(B, n_q, KV),
        in_specs=[pl.BlockSpec((1, 1, tq, n_rep * hd),
                               lambda b, qi, g: (b, g, qi, 0)),
                  pl.BlockSpec((1, n_rep * hd, D), lambda b, qi, g: (g, 0, 0))],
        out_specs=pl.BlockSpec((1, tq, D), lambda b, qi, g: (b, qi, 0)),
        compiler_params=pltpu.CompilerParams(
            dimension_semantics=("parallel", "parallel", "arbitrary"),
            vmem_limit_bytes=64 * 1024 * 1024),
    )(ctx, wo_g)

    return out


# --------------------------- pure-JAX reference -------------------------------

def ref_gqa(x, wq, wk, wv, wo, cos, sin, *, num_heads, num_kv_heads, head_dim):
    B, S, D = x.shape
    q = (x @ wq).reshape(B, S, num_heads, head_dim)
    k = (x @ wk).reshape(B, S, num_kv_heads, head_dim)
    v = (x @ wv).reshape(B, S, num_kv_heads, head_dim)

    def rot(t):
        t1, t2 = jnp.split(t, 2, axis=-1)
        return jnp.concatenate([-t2, t1], axis=-1)

    c = cos[None, :, None, :]
    s = sin[None, :, None, :]
    q = q * c + rot(q) * s
    k = k * c + rot(k) * s
    q, k, v = (t.transpose(0, 2, 1, 3) for t in (q, k, v))
    n_rep = num_heads // num_kv_heads
    k = jnp.repeat(k, n_rep, axis=1)
    v = jnp.repeat(v, n_rep, axis=1)
    scores = jnp.einsum('bhqd,bhkd->bhqk', q, k) / math.sqrt(head_dim)
    mask = jnp.triu(jnp.ones((S, S), dtype=bool), 1)
    scores = jnp.where(mask[None, None], -jnp.inf, scores)
    w = jax.nn.softmax(scores, axis=-1)
    ctx = jnp.einsum('bhqk,bhkd->bhqd', w, v)
    ctx = ctx.transpose(0, 2, 1, 3).reshape(B, S, num_heads * head_dim)
    return ctx @ wo


# ------------------------------------ main ------------------------------------

if __name__ == "__main__":
    B, S, D = 2, 8, 32
    num_heads, num_kv_heads = 4, 2
    head_dim = D // num_heads            # 8

    key = jax.random.PRNGKey(0)
    ks = jax.random.split(key, 5)
    w_scale = 1.0 / math.sqrt(D)

    x = jax.random.normal(ks[0], (B, S, D), dtype=jnp.float32)
    # weights, already transposed to (in_features, out_features)
    wq = w_scale * jax.random.normal(ks[1], (D, num_heads * head_dim), dtype=jnp.float32)
    wk = w_scale * jax.random.normal(ks[2], (D, num_kv_heads * head_dim), dtype=jnp.float32)
    wv = w_scale * jax.random.normal(ks[3], (D, num_kv_heads * head_dim), dtype=jnp.float32)
    wo = (1.0 / math.sqrt(num_heads * head_dim)) * jax.random.normal(
        ks[4], (num_heads * head_dim, D), dtype=jnp.float32)

    # RoPE cos/sin cache for positions 0..S-1 (matches RotaryEmbedding defaults)
    inv_freq = 1.0 / (10000.0 ** (jnp.arange(0, head_dim, 2, dtype=jnp.float32) / head_dim))
    t = jnp.arange(S, dtype=jnp.float32)
    freqs = t[:, None] * inv_freq[None, :]
    emb = jnp.concatenate([freqs, freqs], axis=-1)       # (S, head_dim)
    cos = jnp.cos(emb)
    sin = jnp.sin(emb)

    # TODO(synk): dropout (p=0 in eval) and the sliding_window branch (None by
    # default) are not implemented; only the default causal path is covered.

    out = gqa_forward(x, wq, wk, wv, wo, cos, sin, num_heads=num_heads,
                      num_kv_heads=num_kv_heads, head_dim=head_dim)
    out = jax.block_until_ready(out)

    ref = ref_gqa(x, wq, wk, wv, wo, cos, sin, num_heads=num_heads,
                  num_kv_heads=num_kv_heads, head_dim=head_dim)
    err = float(jnp.max(jnp.abs(out - ref)))
    assert out.shape == (B, S, D)
    # bf16 MXU operands + bf16 ctx/RoPE vs. a pure-f32 reference -> bf16-level tol.
    assert jnp.allclose(out, ref, atol=5e-2, rtol=5e-2), f"max abs err {err}"

    print("KERNEL_OK")
</pallas_src>

<mosaic_0001>
module attributes {stable_mosaic.version = 11 : i64} {
  func.func @_qkv_rope_kernel(%arg0: i32, %arg1: i32, %arg2: i32, %arg3: memref<1x8x32xbf16, #tpu.memory_space<vmem>>, %arg4: memref<32x64xbf16, #tpu.memory_space<vmem>>, %arg5: memref<8x8xbf16, #tpu.memory_space<vmem>>, %arg6: memref<8x8xbf16, #tpu.memory_space<vmem>>, %arg7: memref<1x4x8x8xbf16, #tpu.memory_space<vmem>>, %arg8: memref<1x2x8x8xbf16, #tpu.memory_space<vmem>>, %arg9: memref<1x2x8x8xbf16, #tpu.memory_space<vmem>>, %arg10: memref<8x64xf32, #tpu.memory_space<vmem>>) attributes {dimension_semantics = [#tpu.dimension_semantics<parallel>, #tpu.dimension_semantics<parallel>, #tpu.dimension_semantics<arbitrary>], iteration_bounds = array<i64: 2, 1, 1>, scalar_prefetch = 0 : i64, scratch_operands = 1 : i64, tpu.core_type = #tpu.core_type<tc>, window_params = [{transform_indices = @transform_0, window_bounds = array<i64: 1, 8, 32>}, {transform_indices = @transform_1, window_bounds = array<i64: 32, 64>}, {transform_indices = @transform_2, window_bounds = array<i64: 8, 8>}, {transform_indices = @transform_3, window_bounds = array<i64: 8, 8>}, {transform_indices = @transform_4, window_bounds = array<i64: 1, 4, 8, 8>}, {transform_indices = @transform_5, window_bounds = array<i64: 1, 2, 8, 8>}, {transform_indices = @transform_6, window_bounds = array<i64: 1, 2, 8, 8>}]} {
    %c0_i32 = arith.constant 0 : i32
    %0 = arith.cmpi eq, %arg2, %c0_i32 : i32
    %1 = arith.extui %0 : i1 to i32
    %c0_i32_0 = arith.constant 0 : i32
    %2 = arith.cmpi ne, %1, %c0_i32_0 : i32
    scf.if %2 {
      %cst_11 = arith.constant 0.000000e+00 : f32
      %13 = vector.broadcast %cst_11 : f32 to vector<8x64xf32>
      %c0_12 = arith.constant 0 : index
      %c0_13 = arith.constant 0 : index
      %14 = vector.load %arg10[%c0_12, %c0_13] : memref<8x64xf32, #tpu.memory_space<vmem>>, vector<8x64xf32>
      tpu.vector_store %arg10[%c0_12, %c0_13], %13 {strides = array<i32>} : memref<8x64xf32, #tpu.memory_space<vmem>>, vector<8x64xf32>,
    } else {
    }
    %c0 = arith.constant 0 : index
    %c0_1 = arith.constant 0 : index
    %3 = vector.load %arg10[%c0, %c0_1] : memref<8x64xf32, #tpu.memory_space<vmem>>, vector<8x64xf32>
    %c0_2 = arith.constant 0 : index
    %c0_3 = arith.constant 0 : index
    %c0_4 = arith.constant 0 : index
    %4 = vector.load %arg3[%c0_2, %c0_3, %c0_4] : memref<1x8x32xbf16, #tpu.memory_space<vmem>>, vector<1x8x32xbf16>
    %5 = vector.shape_cast %4 : vector<1x8x32xbf16> to vector<8x32xbf16>
    %c0_5 = arith.constant 0 : index
    %c0_6 = arith.constant 0 : index
    %6 = vector.load %arg4[%c0_5, %c0_6] : memref<32x64xbf16, #tpu.memory_space<vmem>>, vector<32x64xbf16>
    %cst = arith.constant dense<0.000000e+00> : vector<8x64xf32>
    %7 = tpu.matmul %5, %6, %cst {dimension_numbers = #tpu.dot_dimension_numbers<[1], [0], [0], [1], [0, 0, 1, 1], [], []>} : vector<8x32xbf16>, vector<32x64xbf16>, vector<8x64xf32> -> vector<8x64xf32>
    %8 = arith.addf %3, %7 : vector<8x64xf32>
    %c0_7 = arith.constant 0 : index
    %c0_8 = arith.constant 0 : index
    %9 = vector.load %arg10[%c0_7, %c0_8] : memref<8x64xf32, #tpu.memory_space<vmem>>, vector<8x64xf32>
    tpu.vector_store %arg10[%c0_7, %c0_8], %8 {strides = array<i32>} : memref<8x64xf32, #tpu.memory_space<vmem>>, vector<8x64xf32>,
    %c0_i32_9 = arith.constant 0 : i32
    %10 = arith.cmpi eq, %arg2, %c0_i32_9 : i32
    %11 = arith.extui %10 : i1 to i32
    %c0_i32_10 = arith.constant 0 : i32
    %12 = arith.cmpi ne, %11, %c0_i32_10 : i32
    scf.if %12 {
      %c0_11 = arith.constant 0 : index
      %c0_12 = arith.constant 0 : index
      %13 = vector.load %arg10[%c0_11, %c0_12] : memref<8x64xf32, #tpu.memory_space<vmem>>, vector<8x64xf32>
      %14 = arith.truncf %13 : vector<8x64xf32> to vector<8x64xbf16>
      %c0_13 = arith.constant 0 : index
      %c0_14 = arith.constant 0 : index
      %15 = vector.load %arg5[%c0_13, %c0_14] : memref<8x8xbf16, #tpu.memory_space<vmem>>, vector<8x8xbf16>
      %c0_15 = arith.constant 0 : index
      %c0_16 = arith.constant 0 : index
      %16 = vector.load %arg6[%c0_15, %c0_16] : memref<8x8xbf16, #tpu.memory_space<vmem>>, vector<8x8xbf16>
      %17 = vector.extract_strided_slice %14 {offsets = [0, 0], sizes = [8, 8], strides = [1, 1]} : vector<8x64xbf16> to vector<8x8xbf16>
      %18 = vector.extract_strided_slice %17 {offsets = [0, 4], sizes = [8, 4], strides = [1, 1]} : vector<8x8xbf16> to vector<8x4xbf16>
      %19 = vector.extract_strided_slice %17 {offsets = [0, 0], sizes = [8, 4], strides = [1, 1]} : vector<8x8xbf16> to vector<8x4xbf16>
      %20 = tpu.concatenate %18, %19 in 1 : vector<8x4xbf16>, vector<8x4xbf16> -> vector<8x8xbf16>
      %21 = arith.mulf %17, %15 : vector<8x8xbf16>
      %22 = arith.mulf %20, %16 : vector<8x8xbf16>
      %23 = arith.addf %21, %22 : vector<8x8xbf16>
      %c0_17 = arith.constant 0 : index
      %c0_18 = arith.constant 0 : index
      %c0_19 = arith.constant 0 : index
      %c0_20 = arith.constant 0 : index
      %24 = vector.load %arg7[%c0_17, %c0_18, %c0_19, %c0_20] : memref<1x4x8x8xbf16, #tpu.memory_space<vmem>>, vector<1x1x8x8xbf16>
      %25 = vector.shape_cast %24 : vector<1x1x8x8xbf16> to vector<8x8xbf16>
      %26 = vector.shape_cast %23 : vector<8x8xbf16> to vector<1x1x8x8xbf16>
      tpu.vector_store %arg7[%c0_17, %c0_18, %c0_19, %c0_20], %26 {strides = array<i32>} : memref<1x4x8x8xbf16, #tpu.memory_space<vmem>>, vector<1x1x8x8xbf16>,
      %27 = vector.extract_strided_slice %14 {offsets = [0, 8], sizes = [8, 8], strides = [1, 1]} : vector<8x64xbf16> to vector<8x8xbf16>
      %28 = vector.extract_strided_slice %27 {offsets = [0, 4], sizes = [8, 4], strides = [1, 1]} : vector<8x8xbf16> to vector<8x4xbf16>
      %29 = vector.extract_strided_slice %27 {offsets = [0, 0], sizes = [8, 4], strides = [1, 1]} : vector<8x8xbf16> to vector<8x4xbf16>
      %30 = tpu.concatenate %28, %29 in 1 : vector<8x4xbf16>, vector<8x4xbf16> -> vector<8x8xbf16>
      %31 = arith.mulf %27, %15 : vector<8x8xbf16>
      %32 = arith.mulf %30, %16 : vector<8x8xbf16>
      %33 = arith.addf %31, %32 : vector<8x8xbf16>
      %c0_21 = arith.constant 0 : index
      %c1 = arith.constant 1 : index
      %c0_22 = arith.constant 0 : index
      %c0_23 = arith.constant 0 : index
      %34 = vector.load %arg7[%c0_21, %c1, %c0_22, %c0_23] : memref<1x4x8x8xbf16, #tpu.memory_space<vmem>>, vector<1x1x8x8xbf16>
      %35 = vector.shape_cast %34 : vector<1x1x8x8xbf16> to vector<8x8xbf16>
      %36 = vector.shape_cast %33 : vector<8x8xbf16> to vector<1x1x8x8xbf16>
      tpu.vector_store %arg7[%c0_21, %c1, %c0_22, %c0_23], %36 {strides = array<i32>} : memref<1x4x8x8xbf16, #tpu.memory_space<vmem>>, vector<1x1x8x8xbf16>,
      %37 = vector.extract_strided_slice %14 {offsets = [0, 16], sizes = [8, 8], strides = [1, 1]} : vector<8x64xbf16> to vector<8x8xbf16>
      %38 = vector.extract_strided_slice %37 {offsets = [0, 4], sizes = [8, 4], strides = [1, 1]} : vector<8x8xbf16> to vector<8x4xbf16>
      %39 = vector.extract_strided_slice %37 {offsets = [0, 0], sizes = [8, 4], strides = [1, 1]} : vector<8x8xbf16> to vector<8x4xbf16>
      %40 = tpu.concatenate %38, %39 in 1 : vector<8x4xbf16>, vector<8x4xbf16> -> vector<8x8xbf16>
      %41 = arith.mulf %37, %15 : vector<8x8xbf16>
      %42 = arith.mulf %40, %16 : vector<8x8xbf16>
      %43 = arith.addf %41, %42 : vector<8x8xbf16>
      %c0_24 = arith.constant 0 : index
      %c2 = arith.constant 2 : index
      %c0_25 = arith.constant 0 : index
      %c0_26 = arith.constant 0 : index
      %44 = vector.load %arg7[%c0_24, %c2, %c0_25, %c0_26] : memref<1x4x8x8xbf16, #tpu.memory_space<vmem>>, vector<1x1x8x8xbf16>
      %45 = vector.shape_cast %44 : vector<1x1x8x8xbf16> to vector<8x8xbf16>
      %46 = vector.shape_cast %43 : vector<8x8xbf16> to vector<1x1x8x8xbf16>
      tpu.vector_store %arg7[%c0_24, %c2, %c0_25, %c0_26], %46 {strides = array<i32>} : memref<1x4x8x8xbf16, #tpu.memory_space<vmem>>, vector<1x1x8x8xbf16>,
      %47 = vector.extract_strided_slice %14 {offsets = [0, 24], sizes = [8, 8], strides = [1, 1]} : vector<8x64xbf16> to vector<8x8xbf16>
      %48 = vector.extract_strided_slice %47 {offsets = [0, 4], sizes = [8, 4], strides = [1, 1]} : vector<8x8xbf16> to vector<8x4xbf16>
      %49 = vector.extract_strided_slice %47 {offsets = [0, 0], sizes = [8, 4], strides = [1, 1]} : vector<8x8xbf16> to vector<8x4xbf16>
      %50 = tpu.concatenate %48, %49 in 1 : vector<8x4xbf16>, vector<8x4xbf16> -> vector<8x8xbf16>
      %51 = arith.mulf %47, %15 : vector<8x8xbf16>
      %52 = arith.mulf %50, %16 : vector<8x8xbf16>
      %53 = arith.addf %51, %52 : vector<8x8xbf16>
      %c0_27 = arith.constant 0 : index
      %c3 = arith.constant 3 : index
      %c0_28 = arith.constant 0 : index
      %c0_29 = arith.constant 0 : index
      %54 = vector.load %arg7[%c0_27, %c3, %c0_28, %c0_29] : memref<1x4x8x8xbf16, #tpu.memory_space<vmem>>, vector<1x1x8x8xbf16>
      %55 = vector.shape_cast %54 : vector<1x1x8x8xbf16> to vector<8x8xbf16>
      %56 = vector.shape_cast %53 : vector<8x8xbf16> to vector<1x1x8x8xbf16>
      tpu.vector_store %arg7[%c0_27, %c3, %c0_28, %c0_29], %56 {strides = array<i32>} : memref<1x4x8x8xbf16, #tpu.memory_space<vmem>>, vector<1x1x8x8xbf16>,
      %57 = vector.extract_strided_slice %14 {offsets = [0, 32], sizes = [8, 8], strides = [1, 1]} : vector<8x64xbf16> to vector<8x8xbf16>
      %58 = vector.extract_strided_slice %57 {offsets = [0, 4], sizes = [8, 4], strides = [1, 1]} : vector<8x8xbf16> to vector<8x4xbf16>
      %59 = vector.extract_strided_slice %57 {offsets = [0, 0], sizes = [8, 4], strides = [1, 1]} : vector<8x8xbf16> to vector<8x4xbf16>
      %60 = tpu.concatenate %58, %59 in 1 : vector<8x4xbf16>, vector<8x4xbf16> -> vector<8x8xbf16>
      %61 = arith.mulf %57, %15 : vector<8x8xbf16>
      %62 = arith.mulf %60, %16 : vector<8x8xbf16>
      %63 = arith.addf %61, %62 : vector<8x8xbf16>
      %c0_30 = arith.constant 0 : index
      %c0_31 = arith.constant 0 : index
      %c0_32 = arith.constant 0 : index
      %c0_33 = arith.constant 0 : index
      %64 = vector.load %arg8[%c0_30, %c0_31, %c0_32, %c0_33] : memref<1x2x8x8xbf16, #tpu.memory_space<vmem>>, vector<1x1x8x8xbf16>
      %65 = vector.shape_cast %64 : vector<1x1x8x8xbf16> to vector<8x8xbf16>
      %66 = vector.shape_cast %63 : vector<8x8xbf16> to vector<1x1x8x8xbf16>
      tpu.vector_store %arg8[%c0_30, %c0_31, %c0_32, %c0_33], %66 {strides = array<i32>} : memref<1x2x8x8xbf16, #tpu.memory_space<vmem>>, vector<1x1x8x8xbf16>,
      %67 = vector.extract_strided_slice %14 {offsets = [0, 48], sizes = [8, 8], strides = [1, 1]} : vector<8x64xbf16> to vector<8x8xbf16>
      %c0_34 = arith.constant 0 : index
      %c0_35 = arith.constant 0 : index
      %c0_36 = arith.constant 0 : index
      %c0_37 = arith.constant 0 : index
      %68 = vector.load %arg9[%c0_34, %c0_35, %c0_36, %c0_37] : memref<1x2x8x8xbf16, #tpu.memory_space<vmem>>, vector<1x1x8x8xbf16>
      %69 = vector.shape_cast %68 : vector<1x1x8x8xbf16> to vector<8x8xbf16>
      %70 = vector.shape_cast %67 : vector<8x8xbf16> to vector<1x1x8x8xbf16>
      tpu.vector_store %arg9[%c0_34, %c0_35, %c0_36, %c0_37], %70 {strides = array<i32>} : memref<1x2x8x8xbf16, #tpu.memory_space<vmem>>, vector<1x1x8x8xbf16>,
      %71 = vector.extract_strided_slice %14 {offsets = [0, 40], sizes = [8, 8], strides = [1, 1]} : vector<8x64xbf16> to vector<8x8xbf16>
      %72 = vector.extract_strided_slice %71 {offsets = [0, 4], sizes = [8, 4], strides = [1, 1]} : vector<8x8xbf16> to vector<8x4xbf16>
      %73 = vector.extract_strided_slice %71 {offsets = [0, 0], sizes = [8, 4], strides = [1, 1]} : vector<8x8xbf16> to vector<8x4xbf16>
      %74 = tpu.concatenate %72, %73 in 1 : vector<8x4xbf16>, vector<8x4xbf16> -> vector<8x8xbf16>
      %75 = arith.mulf %71, %15 : vector<8x8xbf16>
      %76 = arith.mulf %74, %16 : vector<8x8xbf16>
      %77 = arith.addf %75, %76 : vector<8x8xbf16>
      %c0_38 = arith.constant 0 : index
      %c1_39 = arith.constant 1 : index
      %c0_40 = arith.constant 0 : index
      %c0_41 = arith.constant 0 : index
      %78 = vector.load %arg8[%c0_38, %c1_39, %c0_40, %c0_41] : memref<1x2x8x8xbf16, #tpu.memory_space<vmem>>, vector<1x1x8x8xbf16>
      %79 = vector.shape_cast %78 : vector<1x1x8x8xbf16> to vector<8x8xbf16>
      %80 = vector.shape_cast %77 : vector<8x8xbf16> to vector<1x1x8x8xbf16>
      tpu.vector_store %arg8[%c0_38, %c1_39, %c0_40, %c0_41], %80 {strides = array<i32>} : memref<1x2x8x8xbf16, #tpu.memory_space<vmem>>, vector<1x1x8x8xbf16>,
      %81 = vector.extract_strided_slice %14 {offsets = [0, 56], sizes = [8, 8], strides = [1, 1]} : vector<8x64xbf16> to vector<8x8xbf16>
      %c0_42 = arith.constant 0 : index
      %c1_43 = arith.constant 1 : index
      %c0_44 = arith.constant 0 : index
      %c0_45 = arith.constant 0 : index
      %82 = vector.load %arg9[%c0_42, %c1_43, %c0_44, %c0_45] : memref<1x2x8x8xbf16, #tpu.memory_space<vmem>>, vector<1x1x8x8xbf16>
      %83 = vector.shape_cast %82 : vector<1x1x8x8xbf16> to vector<8x8xbf16>
      %84 = vector.shape_cast %81 : vector<8x8xbf16> to vector<1x1x8x8xbf16>
      tpu.vector_store %arg9[%c0_42, %c1_43, %c0_44, %c0_45], %84 {strides = array<i32>} : memref<1x2x8x8xbf16, #tpu.memory_space<vmem>>, vector<1x1x8x8xbf16>,
    } else {
    }
    return
  }
  func.func @transform_0(%arg0: i32, %arg1: i32, %arg2: i32) -> (i32, i32, i32) {
    %c0_i32 = arith.constant 0 : i32
    return %arg0, %arg1, %arg2 : i32, i32, i32
  }
  func.func @transform_1(%arg0: i32, %arg1: i32, %arg2: i32) -> (i32, i32) {
    %c0_i32 = arith.constant 0 : i32
    %c0_i32_0 = arith.constant 0 : i32
    return %arg2, %c0_i32 : i32, i32
  }
  func.func @transform_2(%arg0: i32, %arg1: i32, %arg2: i32) -> (i32, i32) {
    %c0_i32 = arith.constant 0 : i32
    %c0_i32_0 = arith.constant 0 : i32
    return %arg1, %c0_i32 : i32, i32
  }
  func.func @transform_3(%arg0: i32, %arg1: i32, %arg2: i32) -> (i32, i32) {
    %c0_i32 = arith.constant 0 : i32
    %c0_i32_0 = arith.constant 0 : i32
    return %arg1, %c0_i32 : i32, i32
  }
  func.func @transform_4(%arg0: i32, %arg1: i32, %arg2: i32) -> (i32, i32, i32, i32) {
    %c0_i32 = arith.constant 0 : i32
    %c0_i32_0 = arith.constant 0 : i32
    %c0_i32_1 = arith.constant 0 : i32
    return %arg0, %c0_i32, %arg1, %c0_i32_0 : i32, i32, i32, i32
  }
  func.func @transform_5(%arg0: i32, %arg1: i32, %arg2: i32) -> (i32, i32, i32, i32) {
    %c0_i32 = arith.constant 0 : i32
    %c0_i32_0 = arith.constant 0 : i32
    %c0_i32_1 = arith.constant 0 : i32
    return %arg0, %c0_i32, %arg1, %c0_i32_0 : i32, i32, i32, i32
  }
  func.func @transform_6(%arg0: i32, %arg1: i32, %arg2: i32) -> (i32, i32, i32, i32) {
    %c0_i32 = arith.constant 0 : i32
    %c0_i32_0 = arith.constant 0 : i32
    %c0_i32_1 = arith.constant 0 : i32
    return %arg0, %c0_i32, %arg1, %c0_i32_0 : i32, i32, i32, i32
  }
}

</mosaic_0001>

<bundles_post_ra>
// kernel: tpu_custom_call.1
= control target key start
LH: loop header
LB: loop body
LE: loop exit
PB: predicated region body
PF: predicated region fallthrough
CT: control target
= control target key end

     0   :  { %s1633_s0 = inlined_call_operand.hbm [shape: bf16[2,8,32], index: 0, kind: input, shape index: {}]   ;;  %s1634_s1 = inlined_call_operand.hbm [shape: bf16[32,64], index: 1, kind: input, shape index: {}]   ;;  %s1635_s2 = inlined_call_operand.hbm [shape: bf16[8,8], index: 2, kind: input, shape index: {}]   ;;  %s1636_s3 = inlined_call_operand.vmem [shape: bf16[8,8], index: 3, kind: input, shape index: {}]   ;;  %s1637_s4 = inlined_call_operand.hbm [shape: bf16[2,4,8,8], index: 4, kind: output, shape index: {0}]   ;;  %s1638_s5 = inlined_call_operand.hbm [shape: bf16[2,2,8,8], index: 5, kind: output, shape index: {1}]   ;;  %s1639_s6 = inlined_call_operand.hbm [shape: bf16[2,2,8,8], index: 6, kind: output, shape index: {2}]  }
   0x1   :  { %1643 = sst [smem:[#allocation17_spill]] %s1634_s1 }
   0x2   :  { %1644 = sst [smem:[#allocation18_spill]] %s1635_s2 }
   0x3   :  { %12 = vsyncpa [#allocation4], 0 }
   0x4   :  { %14 = vsyncpa [#allocation4 + $0x1], 0 }
   0x5   :  { %15 = vsyncpa [#allocation7], 0 }
   0x6   :  { %16 = vsyncpa [#allocation5], 0 }
   0x7   :  { %18 = vsyncpa [#allocation5 + $0x1], 0 }
   0x8   :  { %19 = vsyncpa [#allocation11], 0 }
   0x9   :  { %21 = vsyncpa [#allocation11 + $0x1], 0  ;;  %s1312_s21 = smov 0   ;;  %s1314_s22 = smov 0  }
   0xa   :  { %s1316_s23 = smov 0   ;;  %s1318_s24 = smov 0  }
   0xb   :  { %s1320_s25 = smov 0   ;;  %s1322_s26 = smov 0  }
   0xc LB: > { %s1343_s27 = sadd.s32 4294967295, %s1245_s26   ;;  %s1641_s28 = sadd.s32 4294967294, %s1245_s26   ;;  %s1245_s26 = sphi %s1322_s26, %s27_s26   ;;  %s1241_s25 = sphi %s1320_s25, %s1665_s25   ;;  %s1237_s24 = sphi %s1318_s24, %s1664_s24   ;;  %s1233_s23 = sphi %s1316_s23, %s1663_s23   ;;  %s1229_s22 = sphi %s1314_s22, %s1662_s22   ;;  %s1225_s21 = sphi %s1312_s21, %s1661_s21  }
   0xd   : > { %p70_p0 = scmp.ne.s32.totalorder %s1229_s22, %s1225_s21  ;;  %p1640_p1 = scmp.eq.s32.totalorder %s1343_s27, 0 }
   0xe   : > { %p180_p3 = scmp.eq.s32.totalorder %s1641_s28, 1  ;;  %p850_p5 = scmp.ge.s32.totalorder %s1245_s26, 1 }
   0xf   : > { %p1354_p4 = por %p1640_p1, %p70_p0  ;;  %p243_p7 = scmp.lt.s32.totalorder %s1245_s26, 3 }
  0x10   : > { %p1359_p6 = por %p180_p3, %p70_p0  ;;  %s1247_s8 = smov [#allocation6]  }
  0x11   : > { %p1364_p8 = pnand %p850_p5, %p243_p7  ;;  %s258_s9 = sshll.u32 %s1247_s8, 4  ;;  %s259_s9 = int_to_ptr.vmem [resolvable:$true] %s258_s9 }
  0x12   : > { %s1646_s30 = scalar_select %p1359_p6, 1, 0 }
  0x13   : > { %p921_p9 = pneg %p1364_p8  ;;  %s1248_s11 = smov [#allocation8]  }
  0x14   : > { %s274_s12 = sshll.u32 %s1248_s11, 4  ;;  %s1036_s13 = scalar_lea.vmem %s259_s9, 256  ;;  %s275_s12 = int_to_ptr.vmem [resolvable:$true] %s274_s12 }
  0x15   : > { %p1373_p11 = pnand %p921_p9, %p1640_p1  ;;  %p1037_p13 = scmp.ne.s32.totalorder %s259_s9, %s1036_s13 }
  0x16   : > { %p1044_p5 = scmp.lt.s32.totalorder %s259_s9, %s259_s9  ;;  %p1045_p7 = scmp.lt.s32.totalorder %s1036_s13, %s1036_s13 }
  0x17   : > { %p1027_p12 = pneg %p1373_p11 }
  0x18   : > { %p1046_p10 = por %p1045_p7, %p1044_p5 }
  0x19   : > { %p1039_p0 = pnand %p1037_p13, %p1027_p12 }
  0x1b   : > { %p1040_p3 = pneg %p1039_p0 }
  0x1d   : > { %p1047_p9 = pnand %p1046_p10, %p1040_p3 }
  0x1f   : > { %1050 = shalt.err (!%p1047_p9)
}
  0x20   : > { %s1249_s14 = smov 64   ;;  %s1250_s15 = smov 4  }
  0x21   : > { %s1649_s1 = sld [smem:[#allocation17_spill]]  ;;  %s1062_s18 = scalar_lea.vmem %s275_s12, 64 }
  0x22   : > { %p1063_p1 = scmp.ne.s32.totalorder %s275_s12, %s1062_s18  ;;  %p1070_p2 = scmp.lt.s32.totalorder %s275_s12, %s275_s12 }
  0x23   : > { %p1071_p6 = scmp.lt.s32.totalorder %s1062_s18, %s1062_s18 }
  0x24   : > { %p1065_p13 = pnand %p1063_p1, %p1027_p12 }
  0x25   : > { %p1072_p5 = por %p1071_p6, %p1070_p2 }
  0x26   : > { %p1066_p0 = pneg %p1065_p13 }
  0x27   : > { %924 = dma.hbm_to_vmem [thread:$0]  (!%p1373_p11), %s1649_s1, 256, %s259_s9, [#allocation7], %s1249_s14, %s1249_s14, %s1250_s15  }
  0x28   : > { %p1073_p10 = pnand %p1072_p5, %p1066_p0 }
  0x2a   : > { %1076 = shalt.err (!%p1073_p10)
}
  0x2b   : > { %s1650_s2 = sld [smem:[#allocation18_spill]]  ;;  %s46_s8 = sadd.s32 1, %s1241_s25 }
  0x2c   : > { %s57_s9 = sadd.s32 1, %s1233_s23  ;;  %p48_p1 = scmp.ge.s32.totalorder %s46_s8, 2 }
  0x2d   : > { %p64_p2 = scmp.ne.s32.totalorder %s1233_s23, %s1229_s22  ;;  %p65_p6 = scmp.eq.s32.totalorder %s1245_s26, 0 }
  0x2e   : > { %p944_p12 = scmp.lt.s32.totalorder %s1245_s26, 2  ;;  %s1667_s8 = smov (%p48_p1, %s46_s8), 0 }
  0x2f   : > { %p66_p3 = por %p65_p6, %p64_p2  ;;  %p1651_p7 = scmp.eq.s32.totalorder %s1343_s27, 1 }
  0x30   : > { %s50_s11 = ssub.s32 %s1241_s25, %s1667_s8  ;;  %s292_s13 = sand.u32 1, %s1233_s23  }
  0x31   : > { %927 = dma.hbm_to_vmem [thread:$0]  (!%p1373_p11), %s1650_s2, 64, %s275_s12, [#allocation7]  }
  0x32   : > { %p1405_p9 = por %p1651_p7, %p64_p2  ;;  %p55_p13 = scmp.eq.s32.totalorder %s50_s11, 0 }
  0x33   : > { %s855_s12 = sshll.u32 %s292_s13, 2  ;;  %s856_s14 = sshll.u32 %s1241_s25, 6 }
  0x34   : > { %s1414_s15 = scalar_select %p55_p13, %s1233_s23, %s57_s9  }
  0x35   : > { %s303_s18 = scalar_lea.hbm %s1633_s0, %s856_s14  ;;  %s296_s19 = scalar_lea.vmem [#allocation3], %s855_s12 }
  0x36   : > { %s305_s20 = sshll.u32 %s296_s19, 4  ;;  %p1421_p11 = pnand %p944_p12, %p66_p3  ;;  %s306_s20 = int_to_ptr.vmem [resolvable:$true] %s305_s20 }
  0x37   : > { %s293_s1 = scalar_lea.sflag [#allocation4], %s292_s13  ;;  %s1090_s11 = scalar_lea.vmem %s306_s20, 64 }
  0x38   : > { %p1079_p0 = pneg %p1421_p11  ;;  %p1091_p5 = scmp.ne.s32.totalorder %s306_s20, %s1090_s11 }
  0x39   : > { %s1251_s9 = smov [#allocation3]  }
  0x3a   : > { %p1093_p10 = pnand %p1091_p5, %p1079_p0  ;;  %s1095_s2 = sshll.u32 %s1251_s9, 4  ;;  %s1096_s2 = int_to_ptr.vmem [resolvable:$false] %s1095_s2 }
  0x3b   : > { %s1097_s14 = scalar_lea.vmem %s1096_s2, 128  ;;  %p1098_p2 = scmp.lt.s32.totalorder %s306_s20, %s1096_s2 }
  0x3c   : > { %p1094_p1 = pneg %p1093_p10  ;;  %p1099_p6 = scmp.lt.s32.totalorder %s1097_s14, %s1090_s11 }
  0x3e   : > { %p1100_p7 = por %p1099_p6, %p1098_p2 }
  0x40   : > { %p1101_p12 = pnand %p1100_p7, %p1094_p1 }
  0x42   : > { %1104 = shalt.err (!%p1101_p12)
}
  0x43   : > { %931 = dma.hbm_to_vmem [thread:$0]  (!%p1421_p11), %s303_s18, 64, %s306_s20, %s293_s1  }
  0x44   : > { %314 = sbr.rel (%p1364_p8) target bundleno = 707 (0x2c3), region = 36  ;;  %s1432_s13 = sand.u32 (!%p1364_p8), 1, %s1229_s22  }
  0x45   : > { %s858_s12 = sshll.u32 (!%p1364_p8), %s1432_s13, 2  ;;  %s317_s16 = scalar_lea.sflag (!%p1364_p8), [#allocation4], %s1432_s13 }
  0x46   : > { %s320_s17 = scalar_lea.vmem (!%p1364_p8), [#allocation3], %s858_s12 }
  0x49   : > { %1208 = dma.done.wait (%p1354_p4), %s317_s16, 64  }
  0x4a   : > { %1210 = vsyncadd (%p1354_p4), %s317_s16, 4294967232  ;;  %p1654_p3 = scmp.eq.s32.totalorder %s1343_s27, 0 }
  0x4c   : > { %1212 = dma.done.wait (%p1654_p3), [#allocation7], 320   ;;  %p1655_p13 = pmov %p1654_p3 }
  0x4d   : > { %vm381_vm0 = vcmask 523264   ;;  %v1252_v0 = vmov 0.0   ;;  %vm1253_vm1 = vmmov 0   ;;  %v1022_v1 = vld [vmem:[#allocation6 + $0x8] sm:$0xff]   ;;  %v1023_v2 = vld [vmem:[#allocation6] sm:$0xff]   ;;  %vm401_vm2 = vcmask 261120  }
  0x4e   : > { %1214 = vsyncadd (%p1655_p13), [#allocation7], 4294966976  ;;  %382 = vst.msk [vmem:[#allocation2] sm:$0xff] %vm381_vm0, %v1252_v0  ;;  %897 = vmatprep.subr.bf16.mxu0 %v1252_v0  ;;  %901 = vmatprep.mubr.msk.bf16.mxu0 %vm1253_vm1, %v1252_v0  ;;  %v384_v3 = vld [vmem:[%s320_s17] sm:$0xf]  ;;  %s1254_s1 = smov 84  }
  0x4f   : > { %898 = vmatpush3.bf16.msra.mxu0 %v1022_v1  ;;  %s1255_s2 = smov 100   ;;  %s1256_s28 = smov 124   ;;  %v1452_v12 = vld [vmem:[#allocation8] sm:$0xf]  ;;  %vm460_vm3 = vcmask 31744   ;;  %vm468_vm4 = vcmask 60416  }
  0x50   : > { %899 = vmatprep.subr.bf16.mxu0 %v1252_v0  ;;  %s1257_s29 = smov 92   ;;  %s1258_s7 = smov 108   ;;  %v867_v13 = vcombine.low %v1452_v12, %v1452_v12  ;;  %v454_v16 = vld [vmem:[%s1636_s3] sm:$0xf] }
  0x51   : > { %s1259_s18 = smov 116   ;;  %s1260_s19 = smov 40  }
  0x52   : > { %s1261_s20 = smov 32   ;;  %s1262_s11 = smov 16  }
  0x53   : > { %900 = vmatpush3.bf16.msra.mxu0 %v1023_v2  ;;  %s1263_s9 = smov 8   ;;  %s1264_s14 = smov 24  }
  0x54   : > { %s1265_s17 = smov 4   ;;  %s603_s16 = sand.u32 1, %s1343_s27  }
  0x55   : > { %v383_v4 = vld [vmem:[#allocation2] sm:$0xff] }
  0x56   : > { %902 = vmatmul.mubr.msk.bf16.vlgmr.msra.gmra.mxu0 %vm401_vm2, %v384_v3 }
 0x116   : > { %v439_v5 = vpop.f32.mrf.mxu0 }
 0x117   : > { %v445_v6 = vadd.f32 %v439_v5, %v383_v4 }
 0x118   : > { %v903_v7 = vpop.f32.mrf.mxu0 }
 0x119   : > { %447 = vst.msk [vmem:[#allocation2] sm:$0xff] %vm381_vm0, %v445_v6 }
 0x11a   : > { %v442_v8 = vpop.f32.mrf.mxu0 }
 0x11c   : > { %v904_v9 = vpop.f32.mrf.mxu0 }
 0x120   : > { %v451_v10 = vld [vmem:[#allocation2] sm:$0xff] }
 0x121   : > { %v1446_v11 = vpack.c.bf16 %v451_v10, %v451_v10 }
 0x123   : > { %570 = vrot.lane.b32.xlu1 %v1446_v11, %s1254_s1  ;;  %519 = vrot.lane.b32.xlu0 %v1446_v11, %s1255_s2  ;;  %s1266_s1 = smov 96   ;;  %s1267_s2 = smov 88   ;;  %v465_v57 = vmul.bf16 %v1452_v12, %v1446_v11 }
 0x127   : > { %456 = vrot.lane.b32.xlu1 %v1446_v11, %s1256_s28  ;;  %542 = vrot.lane.b32.xlu0 %v1446_v11, %s1257_s29  ;;  %s861_s28 = sshll.u32 %s1432_s13, 4  ;;  %s1268_s29 = smov 120  }
 0x12b   : > { %496 = vrot.lane.b32.xlu1 %v1446_v11, %s1258_s7  ;;  %470 = vrot.lane.b32.xlu0 %v1446_v11, %s1259_s18  ;;  %s1269_s7 = smov 112   ;;  %s1270_s18 = smov 104  }
 0x12f   : > { %575 = vrot.lane.b32.xlu1 %v867_v13, %s1260_s19  ;;  %547 = vrot.lane.b32.xlu0 %v867_v13, %s1261_s20 }
 0x133   : > { %501 = vrot.lane.b32.xlu1 %v867_v13, %s1262_s11  ;;  %478 = vrot.lane.b32.xlu0 %v867_v13, %s1263_s9 }
 0x137   : > { %524 = vrot.lane.b32.xlu0 %v867_v13, %s1264_s14 }
 0x195   : > { %v571_v14 = vpop.permute.xlu1 %570  ;;  %v520_v15 = vpop.permute.xlu0 %519 }
 0x199   : > { %v457_v17 = vpop.permute.xlu1 %456  ;;  %v543_v18 = vpop.permute.xlu0 %542 }
 0x19a   : > { %v545_v19 = vsel %vm460_vm3, %v543_v18, %v520_v15  ;;  %v573_v20 = vsel %vm460_vm3, %v571_v14, %v543_v18 }
 0x19b   : > { %v551_v21 = vmul.bf16 %v545_v19, %v454_v16  ;;  %v579_v22 = vmul.bf16 %v573_v20, %v454_v16 }
 0x19d   : > { %v497_v23 = vpop.permute.xlu1 %496  ;;  %581 = vrot.lane.b32.xlu0 %v579_v22, %s1260_s19  ;;  %553 = vrot.lane.b32.xlu1 %v551_v21, %s1261_s20  ;;  %v471_v24 = vpop.permute.xlu0 %470  ;;  %s1271_s19 = smov 80   ;;  %s1478_s20 = scalar_lea.vmem [#allocation9], %s861_s28 }
 0x19e   : > { %v473_v25 = vsel %vm460_vm3, %v471_v24, %v457_v17  ;;  %v499_v26 = vsel %vm460_vm3, %v497_v23, %v471_v24  ;;  %v522_v29 = vsel %vm460_vm3, %v520_v15, %v497_v23 }
 0x19f   : > { %v482_v27 = vmul.bf16 %v473_v25, %v454_v16  ;;  %v505_v28 = vmul.bf16 %v499_v26, %v454_v16  ;;  %v528_v30 = vmul.bf16 %v522_v29, %v454_v16 }
 0x1a1   : > { %507 = vrot.lane.b32.xlu0 %v505_v28, %s1262_s11  ;;  %484 = vrot.lane.b32.xlu1 %v482_v27, %s1263_s9  ;;  %v548_v31 = vpop.permute.xlu0 %547  ;;  %v576_v32 = vpop.permute.xlu1 %575  ;;  %s1272_s11 = smov 72   ;;  %s862_s9 = sshll.u32 %s1432_s13, 3 }
 0x1a2   : > { %v578_v36 = vmul.bf16 %v576_v32, %v1446_v11  ;;  %v550_v37 = vmul.bf16 %v548_v31, %v1446_v11 }
 0x1a5   : > { %458 = vrot.lane.b32.xlu0 %v1446_v11, %s1265_s17  ;;  %530 = vrot.lane.b32.xlu1 %v528_v30, %s1264_s14  ;;  %v479_v33 = vpop.permute.xlu0 %478  ;;  %v502_v34 = vpop.permute.xlu1 %501  ;;  %s363_s14 = scalar_lea.vmem [#allocation10], %s862_s9 }
 0x1a6   : > { %v504_v42 = vmul.bf16 %v502_v34, %v1446_v11  ;;  %v481_v43 = vmul.bf16 %v479_v33, %v1446_v11  ;;  %s640_s12 = sshll.u32 %s363_s14, 4  ;;  %s1488_s12 = int_to_ptr.vmem [resolvable:$true] %s640_s12 }
 0x1a7   : > { %s1105_s27 = scalar_lea.vmem %s1488_s12, 128 }
 0x1a8   : > { %p1106_p4 = scmp.ne.s32.totalorder %s1488_s12, %s1105_s27 }
 0x1a9   : > { %v525_v35 = vpop.permute.xlu0 %524 }
 0x1aa   : > { %v527_v50 = vmul.bf16 %v525_v35, %v1446_v11  ;;  %p1107_p8 = pnand %p1106_p4, %p1405_p9 }
 0x1ac   : > { %p1108_p11 = pneg %p1107_p8 }
 0x20f   : > { %v554_v38 = vpop.permute.xlu1 %553  ;;  %v582_v39 = vpop.permute.xlu0 %581 }
 0x210   : > { %v556_v40 = vadd.bf16 %v554_v38, %v550_v37  ;;  %v584_v41 = vadd.bf16 %v582_v39, %v578_v36 }
 0x212   : > { %v874_v44 = vcombine.low %v556_v40, %v556_v40  ;;  %v876_v45 = vcombine.low %v584_v41, %v584_v41 }
 0x213   : > { %v485_v46 = vpop.permute.xlu1 %484  ;;  %v508_v47 = vpop.permute.xlu0 %507 }
 0x214   : > { %v487_v48 = vadd.bf16 %v485_v46, %v481_v43  ;;  %v510_v49 = vadd.bf16 %v508_v47, %v504_v42  ;;  %560 = vrot.lane.b32.xlu1 %v874_v44, %s1266_s1  ;;  %588 = vrot.lane.b32.xlu0 %v876_v45, %s1267_s2  ;;  %s1642_s1 = sshll.u32 %s1237_s24, 7 }
 0x215   : > { %s1495_s28 = scalar_lea.hbm %s1638_s5, %s1642_s1 }
 0x216   : > { %v868_v51 = vcombine.low %v487_v48, %v487_v48  ;;  %v870_v52 = vcombine.low %v510_v49, %v510_v49 }
 0x217   : > { %v531_v53 = vpop.permute.xlu1 %530  ;;  %v459_v54 = vpop.permute.xlu0 %458 }
 0x218   : > { %v533_v55 = vadd.bf16 %v531_v53, %v527_v50  ;;  %v463_v56 = vsel %vm460_vm3, %v457_v17, %v459_v54  ;;  %491 = vrot.lane.b32.xlu1 %v868_v51, %s1268_s29  ;;  %514 = vrot.lane.b32.xlu0 %v870_v52, %s1269_s7  ;;  %s1499_s7 = scalar_lea.sflag [#allocation11], %s603_s16 }
 0x219   : > { %v466_v58 = vmul.bf16 %v463_v56, %v454_v16 }
 0x21a   : > { %v872_v59 = vcombine.low %v533_v55, %v533_v55 }
 0x21b   : > { %v467_v60 = vadd.bf16 %v466_v58, %v465_v57 }
 0x21c   : > { %537 = vrot.lane.b32.xlu1 %v872_v59, %s1270_s18  ;;  %566 = vrot.lane.b32.xlu0 %v1446_v11, %s1271_s19  ;;  %s1273_s18 = smov [#allocation10]  }
 0x21d   : > { %469 = vst.msk [vmem:[%s1478_s20] sm:$0xf] %vm468_vm4, %v467_v60  ;;  %s1109_s19 = sshll.u32 %s1273_s18, 4  ;;  %s1110_s19 = int_to_ptr.vmem [resolvable:$false] %s1109_s19 }
 0x21e   : > { %p1112_p0 = scmp.lt.s32.totalorder %s1488_s12, %s1110_s19 }
 0x220   : > { %593 = vrot.lane.b32.xlu1 %v1446_v11, %s1272_s11  ;;  %s1111_s11 = scalar_lea.vmem %s1110_s19, 256 }
 0x221   : > { %p1113_p5 = scmp.lt.s32.totalorder %s1111_s11, %s1105_s27 }
 0x223   : > { %p1114_p10 = por %p1113_p5, %p1112_p0 }
 0x225   : > { %p1115_p1 = pnand %p1114_p10, %p1108_p11 }
 0x286   : > { %v561_v61 = vpop.permute.xlu1 %560  ;;  %v589_v62 = vpop.permute.xlu0 %588 }
 0x287   : > { %563 = vst.msk [vmem:[%s363_s14] sm:$0xf] %vm468_vm4, %v561_v61  ;;  %877 = vst.msk [vmem:[%s363_s14 + $0x4] sm:$0xf] %vm468_vm4, %v589_v62 }
 0x288   : > { %1118 = shalt.err (!%p1115_p1)
}
 0x289   : > { %s1119_s14 = scalar_lea.hbm %s1495_s28, 128  ;;  %s1123_s29 = scalar_lea.hbm %s1638_s5, 256 }
 0x28a   : > { %p1120_p2 = scmp.ne.s32.totalorder %s1495_s28, %s1119_s14  ;;  %p1124_p12 = scmp.lt.s32.totalorder %s1495_s28, %s1638_s5 }
 0x28b   : > { %p1125_p3 = scmp.lt.s32.totalorder %s1123_s29, %s1119_s14 }
 0x28c   : > { %p1121_p6 = pnand %p1120_p2, %p1405_p9 }
 0x28d   : > { %p1126_p13 = por %p1125_p3, %p1124_p12 }
 0x28e   : > { %p1122_p7 = pneg %p1121_p6 }
 0x290   : > { %p1127_p4 = pnand %p1126_p13, %p1122_p7 }
 0x292   : > { %1130 = shalt.err (!%p1127_p4)
}
 0x293   : > { %s1274_s27 = smov 64   ;;  %s623_s1 = sshll.u32 %s1478_s20, 4  ;;  %v492_v63 = vpop.permute.xlu1 %491  ;;  %v515_v0 = vpop.permute.xlu0 %514  ;;  %s1531_s1 = int_to_ptr.vmem [resolvable:$true] %s623_s1 }
 0x294   : > { %916 = dma.vmem_to_hbm [thread:$0]  (%p1405_p9), %s1488_s12, 128, %s1495_s28, %s1499_s7, %s1274_s27, %s1274_s27, %s1265_s17  }
 0x295   : > { %s891_s19 = sshll.u32 %s1237_s24, 8  ;;  %869 = vst.msk [vmem:[%s1478_s20 + $0x4] sm:$0xf] %vm468_vm4, %v492_v63  ;;  %871 = vst.msk [vmem:[%s1478_s20 + $0x8] sm:$0xf] %vm468_vm4, %v515_v0  ;;  %s1540_s12 = scalar_lea.vmem [#allocation12], %s862_s9 }
 0x296   : > { %s1536_s16 = scalar_lea.hbm %s1637_s4, %s891_s19  ;;  %s599_s2 = scalar_lea.sflag [#allocation5], %s1432_s13 }
 0x297   : > { %v538_v1 = vpop.permute.xlu1 %537  ;;  %v567_v2 = vpop.permute.xlu0 %566  ;;  %s1131_s29 = scalar_lea.vmem %s1531_s1, 256  ;;  %s1275_s18 = smov [#allocation9]  }
 0x298   : > { %873 = vst.msk [vmem:[%s1478_s20 + $0xc] sm:$0xf] %vm468_vm4, %v538_v1  ;;  %569 = vst.msk [vmem:[%s1540_s12] sm:$0xf] %vm468_vm4, %v567_v2  ;;  %p1132_p8 = scmp.ne.s32.totalorder %s1531_s1, %s1131_s29  ;;  %s1135_s19 = sshll.u32 %s1275_s18, 4  ;;  %s1136_s19 = int_to_ptr.vmem [resolvable:$false] %s1135_s19 }
 0x299   : > { %s1137_s11 = scalar_lea.vmem %s1136_s19, 512  ;;  %p1138_p5 = scmp.lt.s32.totalorder %s1531_s1, %s1136_s19 }
 0x29a   : > { %p1133_p11 = pnand %p1132_p8, %p1405_p9  ;;  %p1139_p10 = scmp.lt.s32.totalorder %s1137_s11, %s1131_s29 }
 0x29c   : > { %p1134_p0 = pneg %p1133_p11  ;;  %p1140_p1 = por %p1139_p10, %p1138_p5 }
 0x29e   : > { %p1141_p2 = pnand %p1140_p1, %p1134_p0 }
 0x2a0   : > { %1144 = shalt.err (!%p1141_p2)
}
 0x2a1   : > { %s1145_s20 = scalar_lea.hbm %s1536_s16, 256  ;;  %s1149_s14 = scalar_lea.hbm %s1637_s4, 512 }
 0x2a2   : > { %p1146_p6 = scmp.ne.s32.totalorder %s1536_s16, %s1145_s20  ;;  %p1150_p3 = scmp.lt.s32.totalorder %s1536_s16, %s1637_s4 }
 0x2a3   : > { %p1151_p13 = scmp.lt.s32.totalorder %s1149_s14, %s1145_s20 }
 0x2a4   : > { %p1147_p7 = pnand %p1146_p6, %p1405_p9 }
 0x2a5   : > { %p1152_p4 = por %p1151_p13, %p1150_p3 }
 0x2a6   : > { %p1148_p12 = pneg %p1147_p7 }
 0x2a8   : > { %p1153_p8 = pnand %p1152_p4, %p1148_p12 }
 0x2aa   : > { %1156 = shalt.err (!%p1153_p8)
}
 0x2ab   : > { %915 = dma.vmem_to_hbm [thread:$0]  (%p1405_p9), %s1531_s1, 256, %s1536_s16, %s599_s2, %s1274_s27, %s1274_s27, %s1265_s17   ;;  %v594_v3 = vpop.permute.xlu1 %593 }
 0x2ac   : > { %s1656_s29 = sshll.u32 %s1540_s12, 4  ;;  %s1657_s28 = sshll.u32 %s1237_s24, 7  ;;  %878 = vst.msk [vmem:[%s1540_s12 + $0x4] sm:$0xf] %vm468_vm4, %v594_v3  ;;  %s1573_s29 = int_to_ptr.vmem [resolvable:$true] %s1656_s29 }
 0x2ad   : > { %s1580_s20 = scalar_lea.hbm %s1639_s6, %s1657_s28  ;;  %s1157_s13 = scalar_lea.vmem %s1573_s29, 128 }
 0x2ae   : > { %p1158_p11 = scmp.ne.s32.totalorder %s1573_s29, %s1157_s13  ;;  %s1276_s1 = smov [#allocation12]  }
 0x2af   : > { %s1161_s16 = sshll.u32 %s1276_s1, 4  ;;  %s1162_s16 = int_to_ptr.vmem [resolvable:$false] %s1161_s16 }
 0x2b0   : > { %p1159_p0 = pnand %p1158_p11, %p1405_p9  ;;  %s1163_s24 = scalar_lea.vmem %s1162_s16, 256 }
 0x2b1   : > { %p1164_p10 = scmp.lt.s32.totalorder %s1573_s29, %s1162_s16  ;;  %p1165_p1 = scmp.lt.s32.totalorder %s1163_s24, %s1157_s13 }
 0x2b2   : > { %p1160_p5 = pneg %p1159_p0 }
 0x2b3   : > { %p1166_p2 = por %p1165_p1, %p1164_p10 }
 0x2b5   : > { %p1167_p6 = pnand %p1166_p2, %p1160_p5 }
 0x2b7   : > { %1170 = shalt.err (!%p1167_p6)
}
 0x2b8   : > { %s1171_s2 = scalar_lea.hbm %s1580_s20, 128  ;;  %s1175_s14 = scalar_lea.hbm %s1639_s6, 256 }
 0x2b9   : > { %p1172_p7 = scmp.ne.s32.totalorder %s1580_s20, %s1171_s2  ;;  %p1176_p13 = scmp.lt.s32.totalorder %s1580_s20, %s1639_s6 }
 0x2ba   : > { %p1177_p4 = scmp.lt.s32.totalorder %s1175_s14, %s1171_s2 }
 0x2bb   : > { %p1173_p12 = pnand %p1172_p7, %p1405_p9 }
 0x2bc   : > { %p1178_p8 = por %p1177_p4, %p1176_p13 }
 0x2bd   : > { %p1174_p3 = pneg %p1173_p12 }
 0x2bf   : > { %p1179_p11 = pnand %p1178_p8, %p1174_p3 }
 0x2c1   : > { %1182 = shalt.err (!%p1179_p11)
}
 0x2c2   : > { %917 = dma.vmem_to_hbm [thread:$0]  (%p1405_p9), %s1573_s29, 128, %s1580_s20, %s1499_s7, %s1274_s27, %s1274_s27, %s1265_s17  }
 0x2c3 PF: > { %s672_s19 = sand.u32 1, %s1225_s21   ;;  %p1658_p0 = scmp.ne.s32.totalorder %s1646_s30, 0 }
 0x2c4   : > { %p1659_p5 = scmp.ge.s32.totalorder %s1245_s26, 2  ;;  %s673_s11 = scalar_lea.sflag [#allocation5], %s672_s19 }
 0x2c6   : > { %p933_p10 = pnand %p1659_p5, %p1658_p0 }
 0x2c8   : > { %p934_p1 = pneg %p933_p10 }
 0x2ca   : > { %1216 = dma.done.wait (%p934_p1), %s673_s11, 256  }
 0x2cb   : > { %1218 = vsyncadd (%p934_p1), %s673_s11, 4294967040  ;;  %s1660_s10 = sadd.s32 4294967294, %s1245_s26  }
 0x2cc   : > { %s681_s13 = sand.u32 1, %s1660_s10  }
 0x2cd   : > { %s682_s1 = scalar_lea.sflag [#allocation11], %s681_s13 }
 0x2ce   : > { %1220 = dma.done.wait (%p934_p1), %s682_s1, 256  }
 0x2cf   : > { %1222 = vsyncadd (%p934_p1), %s682_s1, 4294967040  ;;  %s27_s26 = sadd.s32 1, %s1245_s26   ;;  %s1661_s21 = smov %s1229_s22 }
 0x2d0   : > { %p24_p9 = scmp.ge.s32.totalorder %s27_s26, 4   ;;  %s1662_s22 = smov %s1233_s23 }
 0x2d1   : > { %s1663_s23 = smov %s1414_s15  ;;  %s1664_s24 = smov %s1241_s25 }
 0x2d2   : > { %s1665_s25 = smov %s1667_s8  ;;  %26 = sbr.rel (!%p24_p9) target bundleno = 12 (0xc), region = 139 }
 0x2d7   :  { %696 = vsyncpa [#allocation4], 1 }
 0x2d8   :  { %698 = vsyncpa [#allocation4 + $0x1], 1 }
 0x2d9   :  { %699 = vsyncpa [#allocation7], 1 }
 0x2da   :  { %700 = vsyncpa [#allocation5], 1 }
 0x2db   :  { %702 = vsyncpa [#allocation5 + $0x1], 1 }
 0x2dc   :  { %703 = vsyncpa [#allocation11], 1 }
 0x2dd   :  { %705 = vsyncpa [#allocation11 + $0x1], 1 }

</bundles_post_ra>
